<compile_context>
chip_gen: v7x
topology: tpu7x:2x2x1
jax: 0.10.0
libtpu: 0.0.40
codegen_flags: <defaults>
</compile_context>

<pallas_src>
import functools

import jax
import jax.numpy as jnp
from jax.experimental import pallas as pl
from jax.experimental.pallas import tpu as pltpu


def _conv_mm_kernel(patches_ref, w_ref, shift_ref, o_ref):
    """grid = (M tiles, K tiles).  The f32 output block doubles as accumulator."""
    kk = pl.program_id(1)
    prod = jnp.dot(patches_ref[...], w_ref[...],
                   preferred_element_type=jnp.float32)        # MXU: bf16 in, f32 acc

    @pl.when(kk == 0)
    def _init():
        o_ref[...] = prod

    @pl.when(kk > 0)
    def _accumulate():
        o_ref[...] += prod

    @pl.when(kk == pl.num_programs(1) - 1)
    def _finalize():
        # Fused conv-bias / BN shift, then ReLU.
        o_ref[...] = jnp.maximum(o_ref[...] + shift_ref[...], 0.0)


def _im2col_nhwc(x, kh, kw, stride, padding):
    """x: (N, C, H, W) -> patches (N*OH*OW, KH*KW*C), built via one NHWC pass."""
    n, c, h, w = x.shape
    xt = jnp.transpose(x, (0, 2, 3, 1))                       # NHWC (small input copy)
    if padding > 0:
        xt = jnp.pad(xt, ((0, 0), (padding, padding), (padding, padding), (0, 0)))
    hp, wp = h + 2 * padding, w + 2 * padding
    oh = (hp - kh) // stride + 1
    ow = (wp - kw) // stride + 1
    cols = [xt[:, i:i + stride * oh:stride, j:j + stride * ow:stride, :]
            for i in range(kh) for j in range(kw)]
    patches = jnp.stack(cols, axis=3)                         # (N, OH, OW, KH*KW, C)
    patches = patches.reshape(n * oh * ow, kh * kw * c)       # K-order: (kh, kw, c)
    return patches, oh, ow


@functools.partial(jax.jit,
                   static_argnames=("stride", "padding", "use_bn", "tm", "max_tk"))
def conv_relu_forward(x, weight, bias, bn_gamma, bn_beta, bn_mean, bn_var,
                      *, stride=1, padding=0, use_bn=False, tm=256, max_tk=1024):
    """Forward pass of Conv: conv2d -> (eval-mode bn) -> relu.  x is NCHW f32."""
    n, c, _, _ = x.shape
    oc, _, kh, kw = weight.shape

    patches, oh, ow = _im2col_nhwc(x, kh, kw, stride, padding)     # (M, K) f32
    m, k = patches.shape

    # Weight in the same (kh, kw, c) K-order as the patches: (KH,KW,C,OC)->(K,OC).
    w_mat = jnp.transpose(weight, (2, 3, 1, 0)).reshape(k, oc)

    # Fold conv bias + eval-mode BN into the weight and a single f32 shift row.
    if use_bn:
        eps = 1e-5
        scale = bn_gamma / jnp.sqrt(bn_var + eps)                  # (OC,)
        shift = bn_beta + (bias - bn_mean) * scale                 # (OC,)
        w_mat = w_mat * scale[None, :]
    else:
        shift = bias
    # TODO(synk): training-mode BatchNorm2d (batch statistics) not implemented.

    # Lane-dense output: pad OC to a multiple of 128 (zero cols -> relu(0) = 0).
    oc_pad = pl.cdiv(oc, 128) * 128
    if oc_pad != oc:
        w_mat = jnp.pad(w_mat, ((0, 0), (0, oc_pad - oc)))
        shift = jnp.pad(shift, (0, oc_pad - oc))
    shift_row = shift.reshape(1, oc_pad).astype(jnp.float32)

    # K tiling: single block for small K; otherwise zero-pad K and add a
    # reduction grid axis so VMEM stays bounded independent of layer size.
    if k <= max_tk:
        tk = k
    else:
        tk = max_tk
        k_pad = pl.cdiv(k, tk) * tk
        if k_pad != k:
            patches = jnp.pad(patches, ((0, 0), (0, k_pad - k)))
            w_mat = jnp.pad(w_mat, ((0, k_pad - k), (0, 0)))
        k = k_pad
    k_steps = k // tk
    m_steps = pl.cdiv(m, tm)        # uneven final M tile handled by Pallas masking

    # bf16 MXU operands; accumulation and epilogue stay in f32.
    patches_bf = patches.astype(jnp.bfloat16)
    w_bf = w_mat.astype(jnp.bfloat16)

    # Explicit VMEM budget (double-buffered input tiles + resident f32 out tile).
    vmem_need = (2 * tm * tk * 2 + 2 * tk * oc_pad * 2
                 + 2 * oc_pad * 4 + 2 * tm * oc_pad * 4)
    vmem_limit = int(min(max(4 * vmem_need, 32 * 1024 * 1024), 64 * 1024 * 1024))

    cost = pl.CostEstimate(
        flops=2 * m * k * oc_pad,
        transcendentals=0,
        bytes_accessed=(patches_bf.size * 2 + m_steps * w_bf.size * 2
                        + m * oc_pad * 4))

    out = pl.pallas_call(
        _conv_mm_kernel,
        out_shape=jax.ShapeDtypeStruct((m, oc_pad), jnp.float32),
        grid_spec=pltpu.PrefetchScalarGridSpec(
            num_scalar_prefetch=0,
            grid=(m_steps, k_steps),
            in_specs=[
                pl.BlockSpec((tm, tk), lambda i, kk: (i, kk)),       # patch tile
                pl.BlockSpec((tk, oc_pad), lambda i, kk: (kk, 0)),   # weight tile
                pl.BlockSpec((1, oc_pad), lambda i, kk: (0, 0)),     # fused shift
            ],
            out_specs=pl.BlockSpec((tm, oc_pad), lambda i, kk: (i, 0)),
        ),
        compiler_params=pltpu.CompilerParams(
            dimension_semantics=("parallel", "arbitrary"),
            vmem_limit_bytes=vmem_limit),
        cost_estimate=cost,
    )(patches_bf, w_bf, shift_row)

    out = out[:, :oc].reshape(n, oh, ow, oc)                  # NHWC
    return jnp.transpose(out, (0, 3, 1, 2))                   # NCHW (module contract)


def _reference(x, weight, bias, bn_gamma, bn_beta, bn_mean, bn_var,
               *, stride, padding, use_bn):
    """XLA reference matching the kernel's bf16 operand rounding."""
    if use_bn:
        eps = 1e-5
        scale = bn_gamma / jnp.sqrt(bn_var + eps)
        shift = bn_beta + (bias - bn_mean) * scale
        w_eff = weight * scale[:, None, None, None]
    else:
        w_eff = weight
        shift = bias
    xb = x.astype(jnp.bfloat16).astype(jnp.float32)
    wb = w_eff.astype(jnp.bfloat16).astype(jnp.float32)
    y = jax.lax.conv_general_dilated(
        xb, wb, (stride, stride), [(padding, padding), (padding, padding)],
        dimension_numbers=("NCHW", "OIHW", "NCHW"),
        precision=jax.lax.Precision.HIGHEST)
    return jnp.maximum(y + shift.reshape(1, -1, 1, 1), 0.0)


if __name__ == "__main__":
    # Module config: Conv(in_channels=4, out_channels=8, kernel_size=3)
    N, C, H, W = 2, 4, 16, 16
    OC, KH, KW = 8, 3, 3

    key = jax.random.PRNGKey(0)
    kx, kw_, kb, kg, kbeta, kmean, kvar = jax.random.split(key, 7)

    x = jax.random.normal(kx, (N, C, H, W), jnp.float32)
    fan_in = C * KH * KW
    bound = 1.0 / jnp.sqrt(fan_in)
    weight = jax.random.uniform(kw_, (OC, C, KH, KW), jnp.float32, -bound, bound)
    bias = jax.random.uniform(kb, (OC,), jnp.float32, -bound, bound)
    bn_gamma = jax.random.uniform(kg, (OC,), jnp.float32, 0.5, 1.5)
    bn_beta = 0.1 * jax.random.normal(kbeta, (OC,), jnp.float32)
    bn_mean = 0.1 * jax.random.normal(kmean, (OC,), jnp.float32)
    bn_var = jax.random.uniform(kvar, (OC,), jnp.float32, 0.5, 1.5)

    # Case 1: module defaults (stride=1, padding=0, use_bn=False).
    out = conv_relu_forward(x, weight, bias, bn_gamma, bn_beta, bn_mean, bn_var,
                            stride=1, padding=0, use_bn=False)
    out = jax.block_until_ready(out)
    ref = _reference(x, weight, bias, bn_gamma, bn_beta, bn_mean, bn_var,
                     stride=1, padding=0, use_bn=False)
    assert out.shape == (N, OC, H - KH + 1, W - KW + 1)
    assert jnp.allclose(out, ref, atol=2e-3, rtol=2e-3), \
        float(jnp.max(jnp.abs(out - ref)))

    # Case 2: padding=1 with eval-mode BatchNorm folded in.
    out_bn = conv_relu_forward(x, weight, bias, bn_gamma, bn_beta, bn_mean, bn_var,
                               stride=1, padding=1, use_bn=True)
    out_bn = jax.block_until_ready(out_bn)
    ref_bn = _reference(x, weight, bias, bn_gamma, bn_beta, bn_mean, bn_var,
                        stride=1, padding=1, use_bn=True)
    assert out_bn.shape == (N, OC, H, W)
    assert jnp.allclose(out_bn, ref_bn, atol=2e-3, rtol=2e-3), \
        float(jnp.max(jnp.abs(out_bn - ref_bn)))

    print("KERNEL_OK")
</pallas_src>

<mosaic_0001>
module attributes {stable_mosaic.version = 11 : i64} {
  func.func @_conv_mm_kernel(%arg0: i32, %arg1: i32, %arg2: memref<256x36xbf16, #tpu.memory_space<vmem>>, %arg3: memref<36x128xbf16, #tpu.memory_space<vmem>>, %arg4: memref<1x128xf32, #tpu.memory_space<vmem>>, %arg5: memref<256x128xf32, #tpu.memory_space<vmem>>) attributes {dimension_semantics = [#tpu.dimension_semantics<parallel>, #tpu.dimension_semantics<arbitrary>], iteration_bounds = array<i64: 2, 1>, scalar_prefetch = 0 : i64, scratch_operands = 0 : i64, tpu.core_type = #tpu.core_type<tc>, window_params = [{transform_indices = @transform_0, window_bounds = array<i64: 256, 36>}, {transform_indices = @transform_1, window_bounds = array<i64: 36, 128>}, {pipeline_mode = #tpu.pipeline_mode<synchronous>, transform_indices = @transform_2, window_bounds = array<i64: 1, 128>}, {transform_indices = @transform_3, window_bounds = array<i64: 256, 128>}]} {
    %c0 = arith.constant 0 : index
    %c0_0 = arith.constant 0 : index
    %0 = vector.load %arg2[%c0, %c0_0] : memref<256x36xbf16, #tpu.memory_space<vmem>>, vector<256x36xbf16>
    %c0_1 = arith.constant 0 : index
    %c0_2 = arith.constant 0 : index
    %1 = vector.load %arg3[%c0_1, %c0_2] : memref<36x128xbf16, #tpu.memory_space<vmem>>, vector<36x128xbf16>
    %cst = arith.constant dense<0.000000e+00> : vector<256x128xf32>
    %2 = tpu.matmul %0, %1, %cst {dimension_numbers = #tpu.dot_dimension_numbers<[1], [0], [0], [1], [0, 0, 1, 1], [], []>} : vector<256x36xbf16>, vector<36x128xbf16>, vector<256x128xf32> -> vector<256x128xf32>
    %c0_i32 = arith.constant 0 : i32
    %3 = arith.cmpi eq, %arg1, %c0_i32 : i32
    %4 = arith.extui %3 : i1 to i32
    %c0_i32_3 = arith.constant 0 : i32
    %5 = arith.cmpi ne, %4, %c0_i32_3 : i32
    scf.if %5 {
      %c0_8 = arith.constant 0 : index
      %c0_9 = arith.constant 0 : index
      %12 = vector.load %arg5[%c0_8, %c0_9] : memref<256x128xf32, #tpu.memory_space<vmem>>, vector<256x128xf32>
      tpu.vector_store %arg5[%c0_8, %c0_9], %2 {strides = array<i32>} : memref<256x128xf32, #tpu.memory_space<vmem>>, vector<256x128xf32>,
    } else {
    }
    %c0_i32_4 = arith.constant 0 : i32
    %6 = arith.cmpi sgt, %arg1, %c0_i32_4 : i32
    %7 = arith.extui %6 : i1 to i32
    %c0_i32_5 = arith.constant 0 : i32
    %8 = arith.cmpi ne, %7, %c0_i32_5 : i32
    scf.if %8 {
      %c0_8 = arith.constant 0 : index
      %c0_9 = arith.constant 0 : index
      %12 = vector.load %arg5[%c0_8, %c0_9] : memref<256x128xf32, #tpu.memory_space<vmem>>, vector<256x128xf32>
      %13 = arith.addf %12, %2 : vector<256x128xf32>
      %c0_10 = arith.constant 0 : index
      %c0_11 = arith.constant 0 : index
      %14 = vector.load %arg5[%c0_10, %c0_11] : memref<256x128xf32, #tpu.memory_space<vmem>>, vector<256x128xf32>
      tpu.vector_store %arg5[%c0_10, %c0_11], %13 {strides = array<i32>} : memref<256x128xf32, #tpu.memory_space<vmem>>, vector<256x128xf32>,
    } else {
    }
    %c0_i32_6 = arith.constant 0 : i32
    %9 = arith.cmpi eq, %arg1, %c0_i32_6 : i32
    %10 = arith.extui %9 : i1 to i32
    %c0_i32_7 = arith.constant 0 : i32
    %11 = arith.cmpi ne, %10, %c0_i32_7 : i32
    scf.if %11 {
      %c0_8 = arith.constant 0 : index
      %c0_9 = arith.constant 0 : index
      %12 = vector.load %arg5[%c0_8, %c0_9] : memref<256x128xf32, #tpu.memory_space<vmem>>, vector<256x128xf32>
      %c0_10 = arith.constant 0 : index
      %c0_11 = arith.constant 0 : index
      %13 = vector.load %arg4[%c0_10, %c0_11] : memref<1x128xf32, #tpu.memory_space<vmem>>, vector<1x128xf32>
      %14 = vector.broadcast %13 : vector<1x128xf32> to vector<256x128xf32>
      %15 = arith.addf %12, %14 : vector<256x128xf32>
      %cst_12 = arith.constant 0.000000e+00 : f32
      %16 = vector.broadcast %cst_12 : f32 to vector<256x128xf32>
      %17 = arith.maximumf %15, %16 : vector<256x128xf32>
      %c0_13 = arith.constant 0 : index
      %c0_14 = arith.constant 0 : index
      %18 = vector.load %arg5[%c0_13, %c0_14] : memref<256x128xf32, #tpu.memory_space<vmem>>, vector<256x128xf32>
      tpu.vector_store %arg5[%c0_13, %c0_14], %17 {strides = array<i32>} : memref<256x128xf32, #tpu.memory_space<vmem>>, vector<256x128xf32>,
    } else {
    }
    return
  }
  func.func @transform_0(%arg0: i32, %arg1: i32) -> (i32, i32) {
    %c0_i32 = arith.constant 0 : i32
    return %arg0, %arg1 : i32, i32
  }
  func.func @transform_1(%arg0: i32, %arg1: i32) -> (i32, i32) {
    %c0_i32 = arith.constant 0 : i32
    %c0_i32_0 = arith.constant 0 : i32
    return %arg1, %c0_i32 : i32, i32
  }
  func.func @transform_2(%arg0: i32, %arg1: i32) -> (i32, i32) {
    %c0_i32 = arith.constant 0 : i32
    %c0_i32_0 = arith.constant 0 : i32
    %c0_i32_1 = arith.constant 0 : i32
    return %c0_i32, %c0_i32_0 : i32, i32
  }
  func.func @transform_3(%arg0: i32, %arg1: i32) -> (i32, i32) {
    %c0_i32 = arith.constant 0 : i32
    %c0_i32_0 = arith.constant 0 : i32
    return %arg0, %c0_i32 : i32, i32
  }
}

</mosaic_0001>

<bundles_post_ra>
// kernel: conv_relu_forward.1
= control target key start
LH: loop header
LB: loop body
LE: loop exit
PB: predicated region body
PF: predicated region fallthrough
CT: control target
= control target key end

     0   :  { %s1600_s12 = smov 0   ;;  %s1602_s13 = smov 0   ;;  %s1910_s0 = inlined_call_operand.vmem [shape: bf16[392,36], index: 0, kind: input, shape index: {}]   ;;  %s1911_s1 = inlined_call_operand.vmem [shape: bf16[36,128], index: 1, kind: input, shape index: {}]   ;;  %s1912_s2 = inlined_call_operand.vmem [shape: f32[1,128], index: 2, kind: input, shape index: {}]   ;;  %s1913_s3 = inlined_call_operand.vmem [shape: f32[392,128], index: 3, kind: output, shape index: {}]  }
   0x1   :  { %s1604_s14 = smov 0   ;;  %s1606_s15 = smov 0  }
   0x2   :  { %s1608_s16 = smov 0  }
   0x3 LB: > { %s1223_s17 = sadd.s32 4294967295, %s1546_s16   ;;  %s25_s18 = sadd.s32 1, %s1542_s15  ;;  %s1546_s16 = sphi %s1608_s16, %s13_s16   ;;  %s1542_s15 = sphi %s1606_s15, %s1923_s15   ;;  %s1538_s14 = sphi %s1604_s14, %s1922_s14   ;;  %s1534_s13 = sphi %s1602_s13, %s1921_s13   ;;  %s1530_s12 = sphi %s1600_s12, %s1920_s12  }
   0x4   : > { %p27_p0 = scmp.ge.s32.totalorder %s25_s18, 2  ;;  %s107_s19 = sadd.s32 1, %s1534_s13 }
   0x5   : > { %p117_p1 = scmp.ne.s32.totalorder %s1534_s13, %s1530_s12  ;;  %p118_p2 = scmp.eq.s32.totalorder %s1223_s17, 1 }
   0x6   : > { %s1925_s18 = smov (%p27_p0, %s25_s18), 0  ;;  %p1228_p4 = scmp.ge.s32.totalorder %s1546_s16, 1 }
   0x7   : > { %p1632_p3 = por %p118_p2, %p117_p1  ;;  %s104_s21 = ssub.s32 %s1542_s15, %s1925_s18 }
   0x8   : > { %p174_p5 = scmp.lt.s32.totalorder %s1546_s16, 3  ;;  %p105_p6 = scmp.eq.s32.totalorder %s104_s21, 0 }
   0xa   : > { %p175_p7 = pnand %p1228_p4, %p174_p5 }
   0xb   : > { %s1641_s22 = scalar_select %p105_p6, %s1534_s13, %s107_s19  }
   0xc   : > { %178 = sbr.rel (%p175_p7) target bundleno = 326 (0x146), region = 32  ;;  %v1457_v0 = vld [vmem:[%s1911_s1] sm:$0xff] (!%p175_p7)   ;;  %v1458_v1 = vld [vmem:[%s1911_s1 + $0x8] sm:$0xff] (!%p175_p7)   ;;  %s1650_s27 = sshll.u32 (!%p175_p7), %s1538_s14, 5  ;;  %vm419_vm0 = vcmask (!%p175_p7), 1041408   ;;  %vm370_vm1 = vcmask (!%p175_p7), 293888  }
   0xd   : > { %1307 = vmatprep.subr.bf16.mxu0 (!%p175_p7), %v1457_v0  ;;  %1345 = vmatprep.subr.bf16.mxu1 (!%p175_p7), %v1457_v0  ;;  %p214_p8 = scmp.lt.s32.totalorder (!%p175_p7), %s1650_s27, 48  ;;  %v1459_v2 = vld [vmem:[%s1911_s1 + $0x10] ss:$0 sps:$4 sm:$0x33] (!%p175_p7)   ;;  %s206_s8 = sand.u32 (!%p175_p7), 1, %s1530_s12  }
   0xe   : > { %1308 = vmatpush3.bf16.msra.mxu0 (!%p175_p7), %v1457_v0  ;;  %1348 = vmatpush3.bf16.msra.mxu1 (!%p175_p7), %v1457_v0  ;;  %v421_v3 = vsel (!%p175_p7), %vm419_vm0, %v1459_v2, 0  ;;  %v1698_v20 = vld [vmem:[%s1912_s2] ss:$0 sm:$0xff] (!%p175_p7)  ;;  %s1229_s11 = sshll.u32 (!%p175_p7), %s206_s8, 8 }
   0xf   : > { %1309 = vmatprep.subr.bf16.mxu0 (!%p175_p7), %v1458_v1  ;;  %1346 = vmatprep.subr.bf16.mxu1 (!%p175_p7), %v1458_v1  ;;  %s1708_s12 = scalar_lea.vmem (!%p175_p7), [#allocation2], %s1229_s11  }
  0x12   : > { %1310 = vmatpush3.bf16.msra.mxu0 (!%p175_p7), %v1458_v1  ;;  %1349 = vmatpush3.bf16.msra.mxu1 (!%p175_p7), %v1458_v1 }
  0x13   : > { %s215_s30 = scalar_select %p214_p8, %s1650_s27, 48  ;;  %1351 = vmatprep.subr.msk.bf16.mxu0 %vm419_vm0, %v1459_v2  ;;  %1352 = vmatprep.subr.msk.bf16.mxu1 %vm419_vm0, %v1459_v2 }
  0x14   : > { %s866_s17 = ssub.s32 (%p1632_p3), 49, %s1650_s27  ;;  %s1285_s19 = sshll.u32 (%p1632_p3), %s1538_s14, 8 }
  0x15   : > { %s1231_s4 = sshll.u32 %s215_s30, 2  ;;  %p867_p9 = scmp.lt.s32.totalorder (%p1632_p3), %s866_s17, 32 }
  0x16   : > { %s1660_s7 = scalar_lea.vmem %s1910_s0, %s1231_s4  ;;  %1312 = vmatpush3.bf16.msra.mxu0 %v421_v3  ;;  %1350 = vmatpush3.bf16.msra.mxu1 %v421_v3  ;;  %s1773_s24 = scalar_lea.vmem (%p1632_p3), %s1913_s3, %s1285_s19  }
  0x17   : > { %v1460_v4 = vld [vmem:[%s1660_s7] sm:$0xff]   ;;  %v1462_v6 = vld [vmem:[%s1660_s7 + $0x8] sm:$0xff]   ;;  %v1464_v8 = vld [vmem:[%s1660_s7 + $0x10] sm:$0xff]  }
  0x18   : > { %v1461_v5 = vld [vmem:[%s1660_s7 + $0x40] sm:$0xff]   ;;  %1313 = vmatprep.mubr.msk.bf16.mxu0 %vm370_vm1, %v1460_v4  ;;  %v1463_v7 = vld [vmem:[%s1660_s7 + $0x48] sm:$0xff]   ;;  %v1465_v9 = vld [vmem:[%s1660_s7 + $0x50] sm:$0xff]  }
  0x19   : > { %1329 = vmatprep.mubr.msk.bf16.mxu1 %vm370_vm1, %v1461_v5  ;;  %1314 = vmatmul.mubr.msk.bf16.vlgmr.msra.gmra.mrb[0].mxu0 %vm370_vm1, %v1462_v6  ;;  %v1466_v10 = vld [vmem:[%s1660_s7 + $0x18] sm:$0xff]   ;;  %v1468_v12 = vld [vmem:[%s1660_s7 + $0x20] sm:$0xff]   ;;  %v1470_v14 = vld [vmem:[%s1660_s7 + $0x28] sm:$0xff]  }
  0x1a   : > { %1330 = vmatmul.mubr.msk.bf16.vlgmr.msra.gmra.mrb[0].mxu1 %vm370_vm1, %v1463_v7  ;;  %1317 = vmatprep.mubr.msk.bf16.mxu0 %vm370_vm1, %v1464_v8  ;;  %v1467_v11 = vld [vmem:[%s1660_s7 + $0x58] sm:$0xff]   ;;  %v1469_v13 = vld [vmem:[%s1660_s7 + $0x60] sm:$0xff]   ;;  %v1471_v15 = vld [vmem:[%s1660_s7 + $0x68] sm:$0xff]  }
  0x1b   : > { %1333 = vmatprep.mubr.msk.bf16.mxu1 %vm370_vm1, %v1465_v9  ;;  %v1472_v16 = vld [vmem:[%s1660_s7 + $0x30] sm:$0xff]   ;;  %v1474_v18 = vld [vmem:[%s1660_s7 + $0x38] sm:$0xff]  }
  0x1c   : > { %v1473_v17 = vld [vmem:[%s1660_s7 + $0x70] sm:$0xff]   ;;  %v1475_v19 = vld [vmem:[%s1660_s7 + $0x78] sm:$0xff]  }
  0x21   : > { %1318 = vmatmul.mubr.msk.bf16.gmra.mrb[4].mxu0 %vm370_vm1, %v1466_v10 }
  0x22   : > { %1334 = vmatmul.mubr.msk.bf16.gmra.mrb[4].mxu1 %vm370_vm1, %v1467_v11  ;;  %1321 = vmatprep.mubr.msk.bf16.mxu0 %vm370_vm1, %v1468_v12 }
  0x23   : > { %1337 = vmatprep.mubr.msk.bf16.mxu1 %vm370_vm1, %v1469_v13 }
  0x29   : > { %1322 = vmatmul.mubr.msk.bf16.gmra.mrb[8].mxu0 %vm370_vm1, %v1470_v14 }
  0x2a   : > { %1338 = vmatmul.mubr.msk.bf16.gmra.mrb[8].mxu1 %vm370_vm1, %v1471_v15  ;;  %1325 = vmatprep.mubr.msk.bf16.mxu0 %vm370_vm1, %v1472_v16 }
  0x2b   : > { %1341 = vmatprep.mubr.msk.bf16.mxu1 %vm370_vm1, %v1473_v17 }
  0x31   : > { %1326 = vmatmul.mubr.msk.bf16.gmra.mrb[12].mxu0 %vm370_vm1, %v1474_v18 }
  0x32   : > { %1342 = vmatmul.mubr.msk.bf16.gmra.mrb[12].mxu1 %vm370_vm1, %v1475_v19 }
  0xec   : > { %v1315_v21 = vpop.f32.mrb[0].mxu0 }
  0xed   : > { %v1331_v22 = vpop.f32.mrb[0].mxu1  ;;  %v764_v23 = vadd.f32 %v1315_v21, %v1698_v20  ;;  %v457_v25 = vpop.f32.mrb[1].mxu0 }
  0xee   : > { %v780_v24 = vadd.f32 %v1331_v22, %v1698_v20  ;;  %v521_v26 = vpop.f32.mrb[1].mxu1  ;;  %v762_v27 = vadd.f32 %v1698_v20, %v457_v25  ;;  %v1316_v29 = vpop.f32.mrb[2].mxu0 }
  0xef   : > { %v778_v28 = vadd.f32 %v1698_v20, %v521_v26  ;;  %v1332_v30 = vpop.f32.mrb[2].mxu1  ;;  %v796_v31 = vmax.f32 %v764_v23, 0.0  ;;  %v765_v33 = vadd.f32 %v1316_v29, %v1698_v20  ;;  %v460_v35 = vpop.f32.mrb[3].mxu0 }
  0xf0   : > { %v812_v32 = vmax.f32 %v780_v24, 0.0  ;;  %v781_v34 = vadd.f32 %v1332_v30, %v1698_v20  ;;  %v524_v36 = vpop.f32.mrb[3].mxu1  ;;  %v794_v37 = vmax.f32 %v762_v27, 0.0  ;;  %v763_v39 = vadd.f32 %v1698_v20, %v460_v35 }
  0xf1   : > { %v810_v38 = vmax.f32 %v778_v28, 0.0  ;;  %v779_v40 = vadd.f32 %v1698_v20, %v524_v36  ;;  %828 = vst [vmem:[%s1708_s12 + $0x10] sm:$0xff] %v796_v31  ;;  %v797_v41 = vmax.f32 %v765_v33, 0.0 }
  0xf2   : > { %844 = vst [vmem:[%s1708_s12 + $0x90] sm:$0xff] %v812_v32  ;;  %v813_v42 = vmax.f32 %v781_v34, 0.0  ;;  %826 = vst [vmem:[%s1708_s12] sm:$0xff] %v794_v37  ;;  %v795_v43 = vmax.f32 %v763_v39, 0.0 }
  0xf3   : > { %842 = vst [vmem:[%s1708_s12 + $0x80] sm:$0xff] %v810_v38  ;;  %v811_v44 = vmax.f32 %v779_v40, 0.0  ;;  %829 = vst [vmem:[%s1708_s12 + $0x18] sm:$0xff] %v797_v41 }
  0xf4   : > { %845 = vst [vmem:[%s1708_s12 + $0x98] sm:$0xff] %v813_v42  ;;  %827 = vst [vmem:[%s1708_s12 + $0x8] sm:$0xff] %v795_v43  ;;  %v1319_v45 = vpop.f32.mrb[4].mxu0 }
  0xf5   : > { %843 = vst [vmem:[%s1708_s12 + $0x88] sm:$0xff] %v811_v44  ;;  %v1335_v46 = vpop.f32.mrb[4].mxu1  ;;  %v768_v47 = vadd.f32 %v1319_v45, %v1698_v20  ;;  %v473_v49 = vpop.f32.mrb[5].mxu0 }
  0xf6   : > { %v784_v48 = vadd.f32 %v1335_v46, %v1698_v20  ;;  %v537_v50 = vpop.f32.mrb[5].mxu1  ;;  %v766_v51 = vadd.f32 %v1698_v20, %v473_v49  ;;  %v1320_v53 = vpop.f32.mrb[6].mxu0 }
  0xf7   : > { %v782_v52 = vadd.f32 %v1698_v20, %v537_v50  ;;  %v1336_v54 = vpop.f32.mrb[6].mxu1  ;;  %v800_v55 = vmax.f32 %v768_v47, 0.0  ;;  %v769_v57 = vadd.f32 %v1320_v53, %v1698_v20  ;;  %v476_v59 = vpop.f32.mrb[7].mxu0 }
  0xf8   : > { %v816_v56 = vmax.f32 %v784_v48, 0.0  ;;  %v785_v58 = vadd.f32 %v1336_v54, %v1698_v20  ;;  %v540_v60 = vpop.f32.mrb[7].mxu1  ;;  %v798_v61 = vmax.f32 %v766_v51, 0.0  ;;  %v767_v63 = vadd.f32 %v1698_v20, %v476_v59 }
  0xf9   : > { %v814_v62 = vmax.f32 %v782_v52, 0.0  ;;  %v783_v0 = vadd.f32 %v1698_v20, %v540_v60  ;;  %832 = vst [vmem:[%s1708_s12 + $0x30] sm:$0xff] %v800_v55  ;;  %v801_v1 = vmax.f32 %v769_v57, 0.0 }
  0xfa   : > { %848 = vst [vmem:[%s1708_s12 + $0xb0] sm:$0xff] %v816_v56  ;;  %v817_v2 = vmax.f32 %v785_v58, 0.0  ;;  %830 = vst [vmem:[%s1708_s12 + $0x20] sm:$0xff] %v798_v61  ;;  %v799_v3 = vmax.f32 %v767_v63, 0.0 }
  0xfb   : > { %846 = vst [vmem:[%s1708_s12 + $0xa0] sm:$0xff] %v814_v62  ;;  %v815_v4 = vmax.f32 %v783_v0, 0.0  ;;  %833 = vst [vmem:[%s1708_s12 + $0x38] sm:$0xff] %v801_v1 }
  0xfc   : > { %849 = vst [vmem:[%s1708_s12 + $0xb8] sm:$0xff] %v817_v2  ;;  %831 = vst [vmem:[%s1708_s12 + $0x28] sm:$0xff] %v799_v3  ;;  %v1323_v5 = vpop.f32.mrb[8].mxu0 }
  0xfd   : > { %847 = vst [vmem:[%s1708_s12 + $0xa8] sm:$0xff] %v815_v4  ;;  %v1339_v6 = vpop.f32.mrb[8].mxu1  ;;  %v772_v7 = vadd.f32 %v1323_v5, %v1698_v20  ;;  %v489_v9 = vpop.f32.mrb[9].mxu0 }
  0xfe   : > { %v788_v8 = vadd.f32 %v1339_v6, %v1698_v20  ;;  %v553_v10 = vpop.f32.mrb[9].mxu1  ;;  %v770_v11 = vadd.f32 %v1698_v20, %v489_v9  ;;  %v1324_v13 = vpop.f32.mrb[10].mxu0 }
  0xff   : > { %v786_v12 = vadd.f32 %v1698_v20, %v553_v10  ;;  %v1340_v14 = vpop.f32.mrb[10].mxu1  ;;  %v804_v15 = vmax.f32 %v772_v7, 0.0  ;;  %v773_v17 = vadd.f32 %v1324_v13, %v1698_v20  ;;  %v492_v19 = vpop.f32.mrb[11].mxu0 }
 0x100   : > { %v820_v16 = vmax.f32 %v788_v8, 0.0  ;;  %v789_v18 = vadd.f32 %v1340_v14, %v1698_v20  ;;  %v556_v21 = vpop.f32.mrb[11].mxu1  ;;  %v802_v22 = vmax.f32 %v770_v11, 0.0  ;;  %v771_v24 = vadd.f32 %v1698_v20, %v492_v19 }
 0x101   : > { %v818_v23 = vmax.f32 %v786_v12, 0.0  ;;  %v787_v25 = vadd.f32 %v1698_v20, %v556_v21  ;;  %836 = vst [vmem:[%s1708_s12 + $0x50] sm:$0xff] %v804_v15  ;;  %v805_v26 = vmax.f32 %v773_v17, 0.0 }
 0x102   : > { %852 = vst [vmem:[%s1708_s12 + $0xd0] sm:$0xff] %v820_v16  ;;  %v821_v27 = vmax.f32 %v789_v18, 0.0  ;;  %834 = vst [vmem:[%s1708_s12 + $0x40] sm:$0xff] %v802_v22  ;;  %v803_v28 = vmax.f32 %v771_v24, 0.0 }
 0x103   : > { %850 = vst [vmem:[%s1708_s12 + $0xc0] sm:$0xff] %v818_v23  ;;  %v819_v29 = vmax.f32 %v787_v25, 0.0  ;;  %837 = vst [vmem:[%s1708_s12 + $0x58] sm:$0xff] %v805_v26 }
 0x104   : > { %853 = vst [vmem:[%s1708_s12 + $0xd8] sm:$0xff] %v821_v27  ;;  %835 = vst [vmem:[%s1708_s12 + $0x48] sm:$0xff] %v803_v28  ;;  %v1327_v30 = vpop.f32.mrb[12].mxu0 }
 0x105   : > { %851 = vst [vmem:[%s1708_s12 + $0xc8] sm:$0xff] %v819_v29  ;;  %v1343_v31 = vpop.f32.mrb[12].mxu1  ;;  %v776_v32 = vadd.f32 %v1327_v30, %v1698_v20  ;;  %v505_v34 = vpop.f32.mrb[13].mxu0 }
 0x106   : > { %v792_v33 = vadd.f32 %v1343_v31, %v1698_v20  ;;  %v569_v35 = vpop.f32.mrb[13].mxu1  ;;  %v774_v36 = vadd.f32 %v1698_v20, %v505_v34  ;;  %v1328_v38 = vpop.f32.mrb[14].mxu0 }
 0x107   : > { %v790_v37 = vadd.f32 %v1698_v20, %v569_v35  ;;  %v1344_v39 = vpop.f32.mrb[14].mxu1  ;;  %v808_v40 = vmax.f32 %v776_v32, 0.0  ;;  %v777_v42 = vadd.f32 %v1328_v38, %v1698_v20  ;;  %v508_v44 = vpop.f32.mrb[15].mxu0  ;;  %864 = sbr.rel (!%p1632_p3) target bundleno = 326 (0x146), region = 48 }
 0x108   : > { %v824_v41 = vmax.f32 %v792_v33, 0.0  ;;  %v793_v43 = vadd.f32 %v1344_v39, %v1698_v20  ;;  %v572_v45 = vpop.f32.mrb[15].mxu1  ;;  %v806_v46 = vmax.f32 %v774_v36, 0.0  ;;  %v775_v48 = vadd.f32 %v1698_v20, %v508_v44 }
 0x109   : > { %v822_v47 = vmax.f32 %v790_v37, 0.0  ;;  %v791_v49 = vadd.f32 %v1698_v20, %v572_v45  ;;  %840 = vst [vmem:[%s1708_s12 + $0x70] sm:$0xff] %v808_v40  ;;  %v809_v50 = vmax.f32 %v777_v42, 0.0 }
 0x10a   : > { %856 = vst [vmem:[%s1708_s12 + $0xf0] sm:$0xff] %v824_v41  ;;  %v825_v51 = vmax.f32 %v793_v43, 0.0  ;;  %838 = vst [vmem:[%s1708_s12 + $0x60] sm:$0xff] %v806_v46  ;;  %v807_v52 = vmax.f32 %v775_v48, 0.0 }
 0x10b   : > { %854 = vst [vmem:[%s1708_s12 + $0xe0] sm:$0xff] %v822_v47  ;;  %v823_v53 = vmax.f32 %v791_v49, 0.0  ;;  %841 = vst [vmem:[%s1708_s12 + $0x78] sm:$0xff] %v809_v50 }
 0x10c   : > { %857 = vst [vmem:[%s1708_s12 + $0xf8] sm:$0xff] %v825_v51  ;;  %839 = vst [vmem:[%s1708_s12 + $0x68] sm:$0xff] %v807_v52 }
 0x10d   : > { %855 = vst [vmem:[%s1708_s12 + $0xe8] sm:$0xff] %v823_v53 }
 0x10e   : > { %s1927_s17 = smov (!%p867_p9, %s866_s17), 32 }
 0x10f   : > { %s1270_s25 = sshll.u32 %s1927_s17, 7 }
 0x110   : > { %p1273_p10 = scmp.eq.s32.totalorder %s1270_s25, 0 }
 0x111   : > { %s1779_s26 = sshrl.u32 (!%p1273_p10), %s1927_s17, 5 }
 0x112   : > { %875 = sbr.rel (%p1273_p10) target bundleno = 326 (0x146), region = 52  ;;  %p1274_p11 = scmp.le.s32.totalorder (!%p1273_p10), %s1779_s26, 0 }
 0x119   : > { %1162 = sbr.rel (%p1274_p11) target bundleno = 305 (0x131), region = 131  ;;  %s1915_s14 = smov (!%p1274_p11), %s1773_s24 }
 0x11a   : > { %s1916_s20 = smov (!%p1274_p11), %s1708_s12  ;;  %s1788_s27 = smov (!%p1274_p11), 0  }
 0x11b   : > { %s1790_s28 = smov (!%p1274_p11), 0  }
 0x120 LB: >> { %v999_v20 = vld [vmem:[%s1554_s20] sm:$0xff]  ;;  %v1001_v54 = vld [vmem:[%s1554_s20 + $0x8] sm:$0xff]  ;;  %v1003_v55 = vld [vmem:[%s1554_s20 + $0x10] sm:$0xff]  ;;  %s1063_s29 = sadd.s32 1, %s1558_s27  ;;  %s993_s28 = sadd.s32 1, %s1562_s28   ;;  %s1562_s28 = sphi %s1790_s28, %s993_s28   ;;  %s1558_s27 = sphi %s1788_s27, %s1919_s27   ;;  %s1554_s20 = sphi %s1916_s20, %s1918_s20   ;;  %s1550_s14 = sphi %s1915_s14, %s1917_s14  }
 0x121   : >> { %1000 = vst [vmem:[%s1550_s14] sm:$0xff] %v999_v20  ;;  %1002 = vst [vmem:[%s1550_s14 + $0x8] sm:$0xff] %v1001_v54  ;;  %v1005_v56 = vld [vmem:[%s1554_s20 + $0x18] sm:$0xff]  ;;  %v1007_v57 = vld [vmem:[%s1554_s20 + $0x20] sm:$0xff]  ;;  %p1064_p12 = scmp.ge.s32.totalorder %s1063_s29, %s1779_s26  ;;  %p992_p13 = scmp.ge.s32.totalorder %s993_s28, %s1779_s26 }
 0x122   : >> { %1004 = vst [vmem:[%s1550_s14 + $0x10] sm:$0xff] %v1003_v55  ;;  %v1009_v58 = vld [vmem:[%s1554_s20 + $0x28] sm:$0xff]  ;;  %1006 = vst [vmem:[%s1550_s14 + $0x18] sm:$0xff] %v1005_v56  ;;  %v1011_v59 = vld [vmem:[%s1554_s20 + $0x30] sm:$0xff] }
 0x123   : >> { %1008 = vst [vmem:[%s1550_s14 + $0x20] sm:$0xff] %v1007_v57  ;;  %1010 = vst [vmem:[%s1550_s14 + $0x28] sm:$0xff] %v1009_v58  ;;  %v1013_v60 = vld [vmem:[%s1554_s20 + $0x38] sm:$0xff]  ;;  %v1015_v61 = vld [vmem:[%s1554_s20 + $0x40] sm:$0xff]  ;;  %s1929_s29 = smov (%p1064_p12, %s1063_s29), 0 }
 0x124   : >> { %1012 = vst [vmem:[%s1550_s14 + $0x30] sm:$0xff] %v1011_v59  ;;  %1014 = vst [vmem:[%s1550_s14 + $0x38] sm:$0xff] %v1013_v60  ;;  %v1017_v62 = vld [vmem:[%s1554_s20 + $0x48] sm:$0xff]  ;;  %v1019_v63 = vld [vmem:[%s1554_s20 + $0x50] sm:$0xff]  ;;  %s1275_s30 = sshll.u32 %s1929_s29, 8  ;;  %s1919_s27 = smov %s1929_s29 }
 0x125   : >> { %1016 = vst [vmem:[%s1550_s14 + $0x40] sm:$0xff] %v1015_v61  ;;  %v1021_v0 = vld [vmem:[%s1554_s20 + $0x58] sm:$0xff]  ;;  %1018 = vst [vmem:[%s1550_s14 + $0x48] sm:$0xff] %v1017_v62  ;;  %v1023_v1 = vld [vmem:[%s1554_s20 + $0x60] sm:$0xff]  ;;  %s1846_s4 = scalar_lea.vmem %s1708_s12, %s1275_s30 [#allocation2]   ;;  %s1069_s5 = scalar_lea.vmem %s1773_s24, %s1275_s30  }
 0x126   : >> { %1020 = vst [vmem:[%s1550_s14 + $0x50] sm:$0xff] %v1019_v63  ;;  %1022 = vst [vmem:[%s1550_s14 + $0x58] sm:$0xff] %v1021_v0  ;;  %v1025_v2 = vld [vmem:[%s1554_s20 + $0x68] sm:$0xff]  ;;  %v1027_v3 = vld [vmem:[%s1554_s20 + $0x70] sm:$0xff] }
 0x127   : >> { %1024 = vst [vmem:[%s1550_s14 + $0x60] sm:$0xff] %v1023_v1  ;;  %1026 = vst [vmem:[%s1550_s14 + $0x68] sm:$0xff] %v1025_v2  ;;  %v1029_v4 = vld [vmem:[%s1554_s20 + $0x78] sm:$0xff]  ;;  %v1031_v5 = vld [vmem:[%s1554_s20 + $0x80] sm:$0xff] }
 0x128   : >> { %1028 = vst [vmem:[%s1550_s14 + $0x70] sm:$0xff] %v1027_v3  ;;  %v1033_v6 = vld [vmem:[%s1554_s20 + $0x88] sm:$0xff]  ;;  %1030 = vst [vmem:[%s1550_s14 + $0x78] sm:$0xff] %v1029_v4  ;;  %v1035_v7 = vld [vmem:[%s1554_s20 + $0x90] sm:$0xff] }
 0x129   : >> { %1032 = vst [vmem:[%s1550_s14 + $0x80] sm:$0xff] %v1031_v5  ;;  %1034 = vst [vmem:[%s1550_s14 + $0x88] sm:$0xff] %v1033_v6  ;;  %v1037_v8 = vld [vmem:[%s1554_s20 + $0x98] sm:$0xff]  ;;  %v1039_v9 = vld [vmem:[%s1554_s20 + $0xa0] sm:$0xff] }
 0x12a   : >> { %1036 = vst [vmem:[%s1550_s14 + $0x90] sm:$0xff] %v1035_v7  ;;  %1038 = vst [vmem:[%s1550_s14 + $0x98] sm:$0xff] %v1037_v8  ;;  %v1041_v10 = vld [vmem:[%s1554_s20 + $0xa8] sm:$0xff]  ;;  %v1043_v11 = vld [vmem:[%s1554_s20 + $0xb0] sm:$0xff]  ;;  %995 = sbr.rel (!%p992_p13) target bundleno = 288 (0x120), region = 137 }
 0x12b   : >> { %1040 = vst [vmem:[%s1550_s14 + $0xa0] sm:$0xff] %v1039_v9  ;;  %v1045_v12 = vld [vmem:[%s1554_s20 + $0xb8] sm:$0xff]  ;;  %1042 = vst [vmem:[%s1550_s14 + $0xa8] sm:$0xff] %v1041_v10  ;;  %v1047_v13 = vld [vmem:[%s1554_s20 + $0xc0] sm:$0xff] }
 0x12c   : >> { %1044 = vst [vmem:[%s1550_s14 + $0xb0] sm:$0xff] %v1043_v11  ;;  %1046 = vst [vmem:[%s1550_s14 + $0xb8] sm:$0xff] %v1045_v12  ;;  %v1049_v14 = vld [vmem:[%s1554_s20 + $0xc8] sm:$0xff]  ;;  %v1051_v15 = vld [vmem:[%s1554_s20 + $0xd0] sm:$0xff] }
 0x12d   : >> { %1048 = vst [vmem:[%s1550_s14 + $0xc0] sm:$0xff] %v1047_v13  ;;  %1050 = vst [vmem:[%s1550_s14 + $0xc8] sm:$0xff] %v1049_v14  ;;  %v1053_v16 = vld [vmem:[%s1554_s20 + $0xd8] sm:$0xff]  ;;  %v1055_v17 = vld [vmem:[%s1554_s20 + $0xe0] sm:$0xff] }
 0x12e   : >> { %1052 = vst [vmem:[%s1550_s14 + $0xd0] sm:$0xff] %v1051_v15  ;;  %v1057_v18 = vld [vmem:[%s1554_s20 + $0xe8] sm:$0xff]  ;;  %1054 = vst [vmem:[%s1550_s14 + $0xd8] sm:$0xff] %v1053_v16  ;;  %v1059_v19 = vld [vmem:[%s1554_s20 + $0xf0] sm:$0xff] }
 0x12f   : >> { %1056 = vst [vmem:[%s1550_s14 + $0xe0] sm:$0xff] %v1055_v17  ;;  %1058 = vst [vmem:[%s1550_s14 + $0xe8] sm:$0xff] %v1057_v18  ;;  %v1061_v21 = vld [vmem:[%s1554_s20 + $0xf8] sm:$0xff]  ;;  %s1918_s20 = smov %s1846_s4 }
 0x130   : >> { %1060 = vst [vmem:[%s1550_s14 + $0xf0] sm:$0xff] %v1059_v19  ;;  %1062 = vst [vmem:[%s1550_s14 + $0xf8] sm:$0xff] %v1061_v21  ;;  %s1917_s14 = smov %s1069_s5 }
 0x131 PF: > { %s1887_s6 = sand.u32 31, %s1927_s17   ;;  %s1286_s7 = sshll.u32 %s1779_s26, 8 }
 0x132   : > { %s1074_s8 = scalar_lea.vmem %s1708_s12, %s1286_s7 [#allocation2]   ;;  %s1076_s9 = scalar_lea.vmem %s1773_s24, %s1286_s7  }
 0x133   : > { %p1280_p0 = scmp.le.s32.totalorder %s1887_s6, 0 }
 0x134   : > { %s1564_s10 = smov (!%p1280_p0), %s1076_s9   ;;  %s1568_s11 = smov (!%p1280_p0), %s1074_s8  }
 0x135   : > { %1176 = sbr.rel (%p1280_p0) target bundleno = 326 (0x146), region = 142  ;;  %s1572_s19 = smov (!%p1280_p0), 0  }
 0x136   : > { %s1576_s21 = smov (!%p1280_p0), 0  }
 0x13c LB: >> { %v1086_v22 = vld [vmem:[%s1570_s11] sm:$0xff]  ;;  %s1088_s17 = sadd.s32 1, %s1574_s19  ;;  %s1080_s21 = sadd.s32 1, %s1578_s21   ;;  %s1578_s21 = sphi %s1576_s21, %s1080_s21   ;;  %s1574_s19 = sphi %s1572_s19, %s1573_s19   ;;  %s1570_s11 = sphi %s1568_s11, %s1093_s11   ;;  %s1566_s10 = sphi %s1564_s10, %s1094_s10  }
 0x13d   : >> { %1087 = vst [vmem:[%s1566_s10] sm:$0xff] %v1086_v22  ;;  %p1089_p1 = scmp.ge.s32.totalorder %s1088_s17, %s1887_s6  ;;  %p1079_p2 = scmp.ge.s32.totalorder %s1080_s21, %s1887_s6 }
 0x13f   : >> { %s1931_s17 = smov (%p1089_p1, %s1088_s17), 0  ;;  %1082 = sbr.rel (!%p1079_p2) target bundleno = 316 (0x13c), region = 148 }
 0x140   : >> { %s1281_s12 = sshll.u32 %s1931_s17, 3  ;;  %s1573_s19 = smov %s1931_s17  }
 0x141   : >> { %s1093_s11 = scalar_lea.vmem %s1074_s8, %s1281_s12 [#allocation2]   ;;  %s1094_s10 = scalar_lea.vmem %s1076_s9, %s1281_s12  }
 0x146 PF: > { %s13_s16 = sadd.s32 1, %s1546_s16   ;;  %s1920_s12 = smov %s1534_s13 }
 0x147   : > { %p10_p3 = scmp.ge.s32.totalorder %s13_s16, 4   ;;  %s1921_s13 = smov %s1641_s22 }
 0x148   : > { %s1922_s14 = smov %s1542_s15  ;;  %s1923_s15 = smov %s1925_s18 }
 0x149   :  { %12 = sbr.rel (!%p10_p3) target bundleno = 3 (0x3), region = 159 }

</bundles_post_ra>
